<compile_context>
chip_gen: v6e
topology: v6e:2x2x1
jax: 0.10.0
libtpu: 0.0.40
codegen_flags: <defaults>
</compile_context>

<pallas_src>
import functools
import math

import numpy as np
import jax
import jax.numpy as jnp
from jax import lax
from jax.experimental import pallas as pl
from jax.experimental.pallas import tpu as pltpu


def _round_up(x, m):
    return ((x + m - 1) // m) * m


def _t2v_cos_kernel(tau_ref, e_ref, o_ref, *, out_features):
    """One row tile of the lane-packed Time2Vec cosine activation.

    tau_ref : (TMP, pack+1)    pack original taus per packed row, last col == 1
    e_ref   : (pack+1, n_lane) fused expansion/FMA matrix:
                e[j, l]    = w_full[l % F] if l // F == j else 0   (j < pack)
                e[pack, l] = b_full[l % F]
    o_ref   : (TMP, n_lane)    o[r, j*F + c] = act(tau[pack*r+j]*w[c] + b[c])
    """
    f = out_features
    # MXU does lane expansion + w-mul + b-add in one tiny-K matmul (idle unit);
    # HIGHEST precision keeps the cos argument at ~f32 accuracy.
    z = jnp.dot(
        tau_ref[...].astype(jnp.float32),
        e_ref[...],
        preferred_element_type=jnp.float32,
        precision=lax.Precision.HIGHEST,
    )                                                         # (TMP, n_lane)
    # Hoisted: computed once per grid step.  Last column of each packed slot is
    # the linear (v2) branch, all others go through cos().
    lane = lax.broadcasted_iota(jnp.int32, o_ref.shape, 1)
    is_cos = (lane % f) < (f - 1)
    # TODO(synk): jnp.cos is an exact-path VPU polynomial; a short minimax
    # range-reduced cosine would further cut the VALU cost if accuracy allows.
    o_ref[...] = jnp.where(is_cos, jnp.cos(z), z).astype(o_ref.dtype)


def cosine_activation_pallas(tau, w, b, w0, b0, *, tile_packed_rows=8192,
                             out_dtype=None):
    """tau: (..., 1) -> (..., out_features). Matches CosineActivation.forward."""
    in_features = tau.shape[-1]
    out_features = w.shape[1] + 1
    if in_features != 1:
        # TODO(synk): PyTorch's bias add for in_features > 1 broadcasts a
        # (in_features, out_features-1) bias against tau's second-to-last dim,
        # which is only well-defined when in_features == 1; not implemented.
        raise NotImplementedError("cosine_activation_pallas supports in_features == 1 only")
    out_dtype = tau.dtype if out_dtype is None else out_dtype

    lead = tau.shape[:-1]
    m = int(np.prod(lead)) if lead else 1
    tau2 = tau.reshape(m, 1).astype(jnp.float32)

    # Fuse cosine-branch and linear-branch params into single (F,) rows.
    w_full = jnp.concatenate([w, w0], axis=-1).reshape(out_features).astype(jnp.float32)
    b_full = jnp.concatenate([b, b0], axis=-1).reshape(out_features).astype(jnp.float32)

    # Lane packing: n_lane = lcm(F, 128) keeps every store an unmasked
    # full-128-lane vst for all divisor-friendly F; fall back to pack=1 when
    # that would make the block excessively wide (odd / huge F).
    if out_features < 128:
        n_lane_cand = (out_features * 128) // math.gcd(out_features, 128)
        pack = n_lane_cand // out_features if n_lane_cand <= 2048 else 1
    else:
        pack = 1
    n_lane = pack * out_features

    # Fused expansion + FMA matrix for the MXU: (pack+1, n_lane).
    e_w = jnp.kron(jnp.eye(pack, dtype=jnp.float32), w_full.reshape(1, -1))  # (pack, n_lane)
    e_b = jnp.tile(b_full, (pack,)).reshape(1, n_lane)                       # (1, n_lane)
    e_mat = jnp.concatenate([e_w, e_b], axis=0)                              # (pack+1, n_lane)

    # Pad packed rows only to 8 sublanes (NOT a full tile) -> minimal wasted
    # work, and the epilogue slice is a no-op whenever m % (8*pack) == 0.
    m_packed = _round_up(max(pl.cdiv(m, pack), 1), 8)
    m_pad = m_packed * pack
    if m_pad != m:
        tau2 = jnp.pad(tau2, ((0, m_pad - m), (0, 0)))
    tau_packed = tau2.reshape(m_packed, pack)
    # Ones column rides the same matmul and carries the bias row of E.
    tau_aug = jnp.concatenate(
        [tau_packed, jnp.ones((m_packed, 1), jnp.float32)], axis=-1)         # (m_packed, pack+1)

    # Row-tile sizing:
    #  * default 8192 packed rows -> 4 MiB output block (>=85% HBM roofline),
    #  * cap output block at ~8 MiB for wide n_lane (VMEM),
    #  * cap at half the rows so there are >=2 grid steps whenever possible
    #    (both v7x TensorCores run the "parallel" axis).
    max_rows_vmem = max(8, ((8 << 20) // (n_lane * 4)) // 8 * 8)
    half_rows = _round_up(pl.cdiv(m_packed, 2), 8)
    tmp_rows = max(8, min(tile_packed_rows, max_rows_vmem, half_rows))
    grid = (pl.cdiv(m_packed, tmp_rows),)   # ragged last block handled by Pallas

    # Explicit VMEM budget: the (tmp_rows, pack+1) tau block is lane-padded to
    # 128 in VMEM, so account for it (v5e default scoped VMEM is only 16 MiB).
    in_block_bytes = tmp_rows * _round_up(pack + 1, 128) * 4
    out_block_bytes = tmp_rows * n_lane * jnp.dtype(out_dtype).itemsize
    e_bytes = _round_up(pack + 1, 8) * n_lane * 4
    vmem_bytes = 2 * (in_block_bytes + out_block_bytes) + 2 * e_bytes + (2 << 20)
    vmem_bytes = int(min(max(vmem_bytes, 32 << 20), 64 << 20))

    kernel = functools.partial(_t2v_cos_kernel, out_features=out_features)

    cost = pl.CostEstimate(
        flops=2 * m_packed * n_lane * (pack + 1),
        transcendentals=m_pad * (out_features - 1),
        bytes_accessed=(4 * m_packed * (pack + 1)
                        + m_packed * n_lane * jnp.dtype(out_dtype).itemsize
                        + 4 * (pack + 1) * n_lane),
    )

    out_packed = pl.pallas_call(
        kernel,
        out_shape=jax.ShapeDtypeStruct((m_packed, n_lane), out_dtype),
        grid=grid,
        in_specs=[
            pl.BlockSpec((tmp_rows, pack + 1), lambda i: (i, 0)),   # streamed row tiles
            pl.BlockSpec((pack + 1, n_lane), lambda i: (0, 0)),     # resident fused params
        ],
        out_specs=pl.BlockSpec((tmp_rows, n_lane), lambda i: (i, 0)),
        compiler_params=pltpu.CompilerParams(
            dimension_semantics=("parallel",),
            vmem_limit_bytes=vmem_bytes,
        ),
        cost_estimate=cost,
    )(tau_aug, e_mat)

    # (m_packed, pack*F) row-major == (m_pad, F): free reshape, then unpad.
    out = out_packed.reshape(m_pad, out_features)
    if m_pad != m:
        out = out[:m]
    return out.reshape(*lead, out_features)


def _reference(tau, w, b, w0, b0):
    v1 = jnp.cos(jnp.matmul(tau, w) + b)
    v2 = jnp.matmul(tau, w0) + b0
    return jnp.concatenate([v1, v2], axis=-1)


if __name__ == "__main__":
    # Typical Time2Vec usage: in_features = 1 (scalar timestamp per position).
    in_features = 1
    out_features = 32
    batch, seq = 2, 8

    key = jax.random.PRNGKey(0)
    k_tau, k_w0, k_b0, k_w, k_b = jax.random.split(key, 5)

    tau = jax.random.normal(k_tau, (batch, seq, in_features), dtype=jnp.float32)
    w0 = jax.random.normal(k_w0, (in_features, 1), dtype=jnp.float32)
    b0 = jax.random.normal(k_b0, (in_features, 1), dtype=jnp.float32)
    w = jax.random.normal(k_w, (in_features, out_features - 1), dtype=jnp.float32)
    b = jax.random.normal(k_b, (in_features, out_features - 1), dtype=jnp.float32)

    out = cosine_activation_pallas(tau, w, b, w0, b0)
    out = jax.block_until_ready(out)
    ref = _reference(tau, w, b, w0, b0)
    assert out.shape == (batch, seq, out_features), out.shape
    np.testing.assert_allclose(np.asarray(out), np.asarray(ref), rtol=1e-5, atol=1e-5)

    # Second check: multiple grid steps, ragged last block (64 packed rows with
    # a 24-row tile) and row padding (tail not a multiple of 8*pack).
    tau2_in = jax.random.normal(k_tau, (2, 125, in_features), dtype=jnp.float32)
    out2 = cosine_activation_pallas(tau2_in, w, b, w0, b0, tile_packed_rows=24)
    out2 = jax.block_until_ready(out2)
    ref2 = _reference(tau2_in, w, b, w0, b0)
    assert out2.shape == (2, 125, out_features), out2.shape
    np.testing.assert_allclose(np.asarray(out2), np.asarray(ref2), rtol=1e-5, atol=1e-5)

    print("KERNEL_OK")
</pallas_src>

<mosaic_0001>
module attributes {stable_mosaic.version = 11 : i64} {
  func.func @_t2v_cos_kernel(%arg0: i32, %arg1: memref<8x5xf32, #tpu.memory_space<vmem>>, %arg2: memref<5x128xf32, #tpu.memory_space<vmem>>, %arg3: memref<8x128xf32, #tpu.memory_space<vmem>>) attributes {dimension_semantics = [#tpu.dimension_semantics<parallel>], iteration_bounds = array<i64: 1>, scalar_prefetch = 0 : i64, scratch_operands = 0 : i64, tpu.core_type = #tpu.core_type<tc>, window_params = [{transform_indices = @transform_0, window_bounds = array<i64: 8, 5>}, {pipeline_mode = #tpu.pipeline_mode<synchronous>, transform_indices = @transform_1, window_bounds = array<i64: 5, 128>}, {transform_indices = @transform_2, window_bounds = array<i64: 8, 128>}]} {
    %c0 = arith.constant 0 : index
    %c0_0 = arith.constant 0 : index
    %0 = vector.load %arg1[%c0, %c0_0] : memref<8x5xf32, #tpu.memory_space<vmem>>, vector<8x5xf32>
    %c0_1 = arith.constant 0 : index
    %c0_2 = arith.constant 0 : index
    %1 = vector.load %arg2[%c0_1, %c0_2] : memref<5x128xf32, #tpu.memory_space<vmem>>, vector<5x128xf32>
    %cst = arith.constant dense<0.000000e+00> : vector<8x128xf32>
    %2 = tpu.matmul %0, %1, %cst {dimension_numbers = #tpu.dot_dimension_numbers<[1], [0], [0], [1], [0, 0, 1, 1], [], []>, precision = #tpu.contract_precision<fp32>} : vector<8x5xf32>, vector<5x128xf32>, vector<8x128xf32> -> vector<8x128xf32>
    %3 = tpu.iota {dimensions = array<i32: 1>} : vector<8x128xi32>
    %c32_i32 = arith.constant 32 : i32
    %c0_i32 = arith.constant 0 : i32
    %4 = arith.cmpi eq, %c32_i32, %c0_i32 : i32
    %c1_i32 = arith.constant 1 : i32
    %5 = arith.select %4, %c1_i32, %c32_i32 : i32
    %6 = vector.broadcast %5 : i32 to vector<8x128xi32>
    %7 = arith.remsi %3, %6 : vector<8x128xi32>
    %c0_i32_3 = arith.constant 0 : i32
    %8 = vector.broadcast %c0_i32_3 : i32 to vector<8x128xi32>
    %9 = arith.cmpi ne, %7, %8 : vector<8x128xi32>
    %c0_i32_4 = arith.constant 0 : i32
    %10 = vector.broadcast %c0_i32_4 : i32 to vector<8x128xi32>
    %11 = arith.cmpi slt, %7, %10 : vector<8x128xi32>
    %c0_i32_5 = arith.constant 0 : i32
    %12 = arith.cmpi slt, %5, %c0_i32_5 : i32
    %13 = vector.broadcast %12 : i1 to vector<8x128xi1>
    %14 = vector.broadcast %13 : vector<8x128xi1> to vector<8x128xi1>
    %15 = arith.xori %11, %14 : vector<8x128xi1>
    %16 = arith.andi %15, %9 : vector<8x128xi1>
    %17 = vector.broadcast %5 : i32 to vector<8x128xi32>
    %18 = arith.addi %7, %17 : vector<8x128xi32>
    %19 = arith.select %16, %18, %7 : vector<8x128xi1>, vector<8x128xi32>
    %c31_i32 = arith.constant 31 : i32
    %20 = vector.broadcast %c31_i32 : i32 to vector<8x128xi32>
    %21 = arith.cmpi slt, %19, %20 : vector<8x128xi32>
    %22 = math.cos %2 : vector<8x128xf32>
    %23 = arith.select %21, %22, %2 : vector<8x128xi1>, vector<8x128xf32>
    %c0_6 = arith.constant 0 : index
    %c0_7 = arith.constant 0 : index
    %24 = vector.load %arg3[%c0_6, %c0_7] : memref<8x128xf32, #tpu.memory_space<vmem>>, vector<8x128xf32>
    tpu.vector_store %arg3[%c0_6, %c0_7], %23 {strides = array<i32>} : memref<8x128xf32, #tpu.memory_space<vmem>>, vector<8x128xf32>,
    return
  }
  func.func @transform_0(%arg0: i32) -> (i32, i32) {
    %c0_i32 = arith.constant 0 : i32
    %c0_i32_0 = arith.constant 0 : i32
    return %arg0, %c0_i32 : i32, i32
  }
  func.func @transform_1(%arg0: i32) -> (i32, i32) {
    %c0_i32 = arith.constant 0 : i32
    %c0_i32_0 = arith.constant 0 : i32
    %c0_i32_1 = arith.constant 0 : i32
    return %c0_i32, %c0_i32_0 : i32, i32
  }
  func.func @transform_2(%arg0: i32) -> (i32, i32) {
    %c0_i32 = arith.constant 0 : i32
    %c0_i32_0 = arith.constant 0 : i32
    return %arg0, %c0_i32 : i32, i32
  }
}

</mosaic_0001>

<bundles_post_ra>
// kernel: tpu_custom_call.1
= control target key start
LH: loop header
LB: loop body
LE: loop exit
PB: predicated region body
PF: predicated region fallthrough
CT: control target
= control target key end

     0   :  { %7 = vsyncpa [#allocation3], 0  ;;  %s822_s0 = inlined_call_operand.hbm [shape: f32[8,5], index: 0, kind: input, shape index: {}]   ;;  %s823_s1 = inlined_call_operand.hbm [shape: f32[5,128], index: 1, kind: input, shape index: {}]   ;;  %s824_s2 = inlined_call_operand.hbm [shape: f32[8,128], index: 2, kind: output, shape index: {}]  }
   0x1   :  { %8 = vsyncpa [#allocation6], 0 }
   0x2   :  { %9 = vsyncpa [#allocation4], 0  ;;  %s759_s9 = smov [#allocation2]   ;;  %s760_s11 = smov [#allocation5]  }
   0x3   :  { %s16_s10 = sshll.u32 %s759_s9, 4  ;;  %s26_s12 = sshll.u32 %s760_s11, 4  ;;  %s17_s10 = int_to_ptr.vmem [resolvable:$true] %s16_s10  ;;  %s27_s12 = int_to_ptr.vmem [resolvable:$true] %s26_s12 }
   0x4   :  { %s701_s13 = scalar_lea.vmem %s17_s10, 128  ;;  %p706_p1 = scmp.lt.s32.totalorder %s17_s10, %s17_s10 }
   0x5   :  { %p702_p0 = scmp.ne.s32.totalorder %s17_s10, %s701_s13  ;;  %p707_p2 = scmp.lt.s32.totalorder %s701_s13, %s701_s13 }
   0x7   :  { %p708_p3 = por %p707_p2, %p706_p1 }
   0x9   :  { %p709_p4 = pnand %p708_p3, %p702_p0 }
   0xb   :  { %712 = shalt.err (!%p709_p4)
}
   0xc   :  { %19 = dma.hbm_to_vmem [thread:$0]  %s822_s0, 128, %s17_s10, [#allocation3]  }
   0xd   :  { %s721_s16 = scalar_lea.vmem %s27_s12, 128  ;;  %p726_p6 = scmp.lt.s32.totalorder %s27_s12, %s27_s12 }
   0xe   :  { %p722_p5 = scmp.ne.s32.totalorder %s27_s12, %s721_s16  ;;  %p727_p7 = scmp.lt.s32.totalorder %s721_s16, %s721_s16 }
  0x10   :  { %p728_p8 = por %p727_p7, %p726_p6 }
  0x12   :  { %p729_p9 = pnand %p728_p8, %p722_p5 }
  0x14   :  { %732 = shalt.err (!%p729_p9)
}
  0x15   :  { %29 = dma.hbm_to_vmem [thread:$0]  %s823_s1, 128, %s27_s12, [#allocation6]  }
  0x16   :  { %753 = dma.done.wait [#allocation3], 128  }
  0x17   :  { %754 = vsyncadd [#allocation3], 4294967168 }
  0x18   :  { %755 = dma.done.wait [#allocation6], 128  }
  0x19   :  { %756 = vsyncadd [#allocation6], 4294967168  ;;  %v761_v0 = vmov 0.0   ;;  %vm762_vm0 = vmmov 0   ;;  %vm42_vm1 = vcmask 1044480   ;;  %vm38_vm2 = vcmask 39936  }
  0x1a   :  { %644 = vmatprep.subr.mxu0 %v761_v0  ;;  %646 = vmatprep.mubr.msk.f32.mxu0 %vm762_vm0, %v761_v0  ;;  %v37_v1 = vld [vmem:[#allocation5] sm:$0x1f]  ;;  %v36_v2 = vld [vmem:[#allocation2] sm:$0xff]  ;;  %v763_v42 = vmov 683565275   ;;  %s769_s0 = smov [#allocation7]  }
  0x1b   :  { %649 = vmatprep.subr.mxu1 %v761_v0  ;;  %651 = vmatprep.mubr.msk.f32.mxu1 %vm762_vm0, %v761_v0  ;;  %v44_v3 = vsel %vm42_vm1, %v37_v1, 0  ;;  %v40_v4 = vsel %vm38_vm2, %v36_v2, 0  ;;  %v764_v44 = vmov 2475754826   ;;  %v765_v47 = vmov 2131351028  }
  0x1c   :  { %v77_v5 = vand.u32 4294901760, %v44_v3  ;;  %v112_v6 = vand.u32 4294901760, %v40_v4  ;;  %v766_v50 = vmov 2102212464   ;;  %v767_v53 = vmov 920167782  }
  0x1d   :  { %v768_v56 = vmov 1326507024   ;;  %s618_s1 = sshll.u32 %s769_s0, 4  ;;  %s619_s1 = int_to_ptr.vmem [resolvable:$true] %s618_s1 }
  0x1e   :  { %645 = vmatpush3.msra.mxu0 %v77_v5  ;;  %v113_v7 = vsub.f32 %v40_v4, %v112_v6  ;;  %v154_v8 = vsub.f32 %v44_v3, %v77_v5  ;;  %s733_s19 = scalar_lea.vmem %s619_s1, 128  ;;  %p738_p11 = scmp.lt.s32.totalorder %s619_s1, %s619_s1 }
  0x1f   :  { %654 = vmatprep.subr.mxu0 %v761_v0  ;;  %p734_p10 = scmp.ne.s32.totalorder %s619_s1, %s733_s19  ;;  %p739_p12 = scmp.lt.s32.totalorder %s733_s19, %s733_s19 }
  0x20   :  { %v114_v9 = vand.u32 4294901760, %v113_v7  ;;  %v155_v10 = vand.u32 4294901760, %v154_v8 }
  0x21   :  { %p740_p13 = por %p739_p12, %p738_p11 }
  0x22   :  { %v115_v11 = vsub.f32 %v113_v7, %v114_v9  ;;  %v156_v12 = vsub.f32 %v154_v8, %v155_v10 }
  0x23   :  { %p741_p0 = pnand %p740_p13, %p734_p10 }
  0x24   :  { %v116_v13 = vand.u32 4294901760, %v115_v11  ;;  %v157_v14 = vand.u32 4294901760, %v156_v12 }
  0x26   :  { %647 = vmatmul.mubr.f32.vlgmr.msra.gmra.mxu0 %v116_v13  ;;  %650 = vmatpush3.msra.mxu1 %v157_v14 }
  0x27   :  { %655 = vmatpush3.msra.mxu0 %v154_v8  ;;  %652 = vmatmul.mubr.f32.vlgmr.msra.gmra.mxu1 %v112_v6 }
  0x28   :  { %659 = vmatprep.subr.mxu1 %v761_v0  ;;  %656 = vmatprep.mubr.msk.f32.mxu0 %vm762_vm0, %v761_v0 }
  0x29   :  { %660 = vmatpush3.msra.mxu1 %v77_v5  ;;  %664 = vmatprep.subr.mxu0 %v761_v0 }
  0x2a   :  { %657 = vmatmul.mubr.f32.vlgmr.msra.gmra.mxu0 %v113_v7  ;;  %661 = vmatprep.mubr.msk.f32.mxu1 %vm762_vm0, %v761_v0 }
  0x2b   :  { %665 = vmatpush3.msra.mxu0 %v155_v10  ;;  %662 = vmatmul.mubr.f32.vlgmr.msra.gmra.mxu1 %v114_v9 }
  0x2c   :  { %669 = vmatprep.subr.mxu1 %v761_v0  ;;  %666 = vmatprep.mubr.msk.f32.mxu0 %vm762_vm0, %v761_v0 }
  0x2d   :  { %670 = vmatpush3.msra.mxu1 %v77_v5  ;;  %671 = vmatprep.mubr.msk.f32.mxu1 %vm762_vm0, %v761_v0 }
  0x2e   :  { %667 = vmatmul.mubr.f32.vlgmr.msra.gmra.mxu0 %v112_v6 }
  0x2f   :  { %672 = vmatmul.mubr.f32.vlgmr.msra.gmra.mxu1 %v112_v6 }
  0xe6   :  { %v118_v15 = vpop.f32.mrf.mxu0 }
  0xe7   :  { %v194_v16 = vpop.f32.mrf.mxu1 }
  0xe8   :  { %v195_v17 = vadd.f32 %v194_v16, %v118_v15  ;;  %v648_v18 = vpop.f32.mrf.mxu0 }
  0xe9   :  { %v653_v19 = vpop.f32.mrf.mxu1 }
  0xea   :  { %v268_v20 = vpop.f32.mrf.mxu0 }
  0xeb   :  { %v269_v21 = vadd.f32 %v268_v20, %v195_v17  ;;  %v342_v22 = vpop.f32.mrf.mxu1 }
  0xec   :  { %v658_v23 = vpop.f32.mrf.mxu0 }
  0xed   :  { %v343_v24 = vadd.f32 %v342_v22, %v269_v21  ;;  %v663_v25 = vpop.f32.mrf.mxu1 }
  0xee   :  { %v416_v26 = vpop.f32.mrf.mxu0 }
  0xef   :  { %v417_v27 = vadd.f32 %v416_v26, %v343_v24  ;;  %v488_v28 = vpop.f32.mrf.mxu1 }
  0xf0   :  { %v668_v29 = vpop.f32.mrf.mxu0 }
  0xf1   :  { %v797_v30 = vadd.f32 %v488_v28, %v417_v27  ;;  %v673_v31 = vpop.f32.mrf.mxu1 }
  0xf3   :  { %v510_v32 = vand.u32 2139095040, %v797_v30  ;;  %v507_v36 = vand.u32 2147483647, %v797_v30  ;;  %vm509_vm10 = vcmp.lt.s32.totalorder %v797_v30, 0  ;;  %vm599_vm0 = vweird.f32 %v797_v30 }
  0xf5   :  { %v511_v33 = vshrl.u32 %v510_v32, 23  ;;  %v514_v40 = vand.u32 8388607, %v507_v36  ;;  %vm508_vm11 = vcmp.le.f32.partialorder %v507_v36, 0.7853982 }
  0xf7   :  { %v628_v34 = vadd.s32 4294967169, %v511_v33  ;;  %v515_v58 = vor.u32 8388608, %v514_v40 }
  0xf9   :  { %v517_v35 = vadd.s32 1, %v628_v34  ;;  %v555_v8 = vshll.u32 %v515_v58, 8 }
  0xfb   :  { %vm518_vm3 = vcmp.gt.s32.totalorder %v517_v35, 0 }
  0xfc   :  { %v519_v37 = vsel %vm518_vm3, %v517_v35, 0 }
  0xfd   :  { %v521_v38 = vand.u32 31, %v519_v37  ;;  %v520_v41 = vshrl.u32 %v519_v37, 5 }
  0xff   :  { %v522_v39 = vsub.s32 32, %v521_v38  ;;  %v524_v43 = vshll.u32 %v763_v42, %v521_v38  ;;  %v527_v45 = vshll.u32 %v764_v44, %v521_v38  ;;  %v530_v49 = vshll.u32 %v765_v47, %v521_v38 }
 0x100   :  { %v533_v52 = vshll.u32 %v766_v50, %v521_v38  ;;  %v536_v55 = vshll.u32 %v767_v53, %v521_v38  ;;  %vm539_vm4 = vcmp.lt.s32.totalorder %v520_v41, 1  ;;  %vm542_vm5 = vcmp.lt.s32.totalorder %v520_v41, 4 }
 0x101   :  { %v525_v46 = vshrl.u32 %v764_v44, %v522_v39  ;;  %v528_v48 = vshrl.u32 %v765_v47, %v522_v39  ;;  %v531_v51 = vshrl.u32 %v766_v50, %v522_v39  ;;  %v534_v54 = vshrl.u32 %v767_v53, %v522_v39 }
 0x102   :  { %v537_v57 = vshrl.u32 %v768_v56, %v522_v39  ;;  %v523_v3 = vshrl.u32 %v763_v42, %v522_v39  ;;  %vm541_vm6 = vcmp.lt.s32.totalorder %v520_v41, 3  ;;  %vm540_vm7 = vcmp.lt.s32.totalorder %v520_v41, 2 }
 0x103   :  { %v526_v59 = vor.u32 %v525_v46, %v524_v43  ;;  %v529_v60 = vor.u32 %v528_v48, %v527_v45  ;;  %v532_v61 = vor.u32 %v531_v51, %v530_v49  ;;  %v535_v62 = vor.u32 %v534_v54, %v533_v52 }
 0x104   :  { %v538_v63 = vor.u32 %v537_v57, %v536_v55  ;;  %v492_v49 = vlaneseq }
 0x105   :  { %v544_v0 = vsel %vm542_vm5, %v532_v61, 2102212464  ;;  %v547_v1 = vsel %vm539_vm4, %v526_v59, %v529_v60  ;;  %v551_v2 = vsel %vm539_vm4, %v529_v60, %v532_v61  ;;  %v548_v4 = vsel %vm542_vm5, %v535_v62, 920167782 }
 0x106   :  { %v552_v5 = vsel %vm542_vm5, %v538_v63, 1326507024  ;;  %v549_v6 = vsel %vm541_vm6, %v532_v61, %v548_v4  ;;  %v543_v9 = vsel %vm539_vm4, %v523_v3, %v526_v59  ;;  %v545_v10 = vsel %vm541_vm6, %v529_v60, %v544_v0 }
 0x107   :  { %v553_v7 = vsel %vm541_vm6, %v535_v62, %v552_v5  ;;  %v550_v11 = vsel %vm540_vm7, %v547_v1, %v549_v6  ;;  %v546_v17 = vsel %vm540_vm7, %v543_v9, %v545_v10  ;;  %v493_v52 = vand.u32 127, %v492_v49 }
 0x108   :  { %v554_v12 = vsel %vm540_vm7, %v551_v2, %v553_v7  ;;  %v806_v15 = vmul.u32.u64.low %v555_v8, %v550_v11  ;;  %v807_v16 = vmul.u32.u64.high %v555_v8, %v550_v11, %v806_v15  ;;  %v562_v19 = vmul.u32 %v555_v8, %v546_v17 }
 0x109   :  { %v803_v13 = vmul.u32.u64.low %v555_v8, %v554_v12  ;;  %v804_v14 = vmul.u32.u64.high %v555_v8, %v554_v12, %v803_v13  ;;  %v498_v55 = vand.u32 31, %v493_v52 }
 0x10a   :  { %v565_v18 = vadd.s32 1, %v807_v16 }
 0x10b   :  { %vm564_vm8 = vc.u32 %v804_v14, %v806_v15  ;;  %v563_v32 = vadd.s32 %v806_v15, %v804_v14  ;;  %vm506_vm14 = vcmp.lt.s32.totalorder %v498_v55, 31 }
 0x10c   :  { %v566_v20 = vsel %vm564_vm8, %v565_v18, %v807_v16 }
 0x10d   :  { %v567_v21 = vadd.s32 %v566_v20, %v562_v19 }
 0x10f   :  { %v568_v22 = vadd.s32 536870912, %v567_v21 }
 0x111   :  { %v569_v23 = vshrl.u32 %v568_v22, 30 }
 0x113   :  { %v570_v24 = vshll.u32 %v569_v23, 30  ;;  %v593_v48 = vsub.s32 4, %v569_v23 }
 0x115   :  { %v571_v25 = vsub.s32 %v567_v21, %v570_v24  ;;  %v594_v50 = vsel %vm509_vm10, %v593_v48, %v569_v23 }
 0x116   :  { %v596_v51 = vsel %vm508_vm11, 0, %v594_v50 }
 0x117   :  { %v573_v26 = vsub.s32 0, %v571_v25  ;;  %v600_v53 = vand.u32 3, %v596_v51 }
 0x119   :  { %v629_v27 = vmin.u32 %v573_v26, %v571_v25  ;;  %vm605_vm12 = vcmp.eq.s32.totalorder %v600_v53, 2  ;;  %vm602_vm13 = vcmp.eq.s32.totalorder %v600_v53, 0  ;;  %vm601_vm15 = vcmp.lt.s32.totalorder %v600_v53, 2 }
 0x11b   :  { %v575_v28 = vclz %v629_v27 }
 0x11d   :  { %v630_v29 = vadd.s32 4294967294, %v575_v28 }
 0x11f   :  { %vm631_vm9 = vcmp.lt.s32.totalorder %v630_v29, 0 }
 0x120   :  { %v578_v31 = vsel %vm631_vm9, 0, %v630_v29 }
 0x121   :  { %v579_v33 = vsub.s32 32, %v578_v31  ;;  %v583_v34 = vsub.s32 4294967266, %v578_v31  ;;  %v580_v35 = vshll.u32 %v571_v25, %v578_v31 }
 0x123   :  { %v581_v37 = vshrl.u32 %v563_v32, %v579_v33  ;;  %v584_v38 = vadd.s32 127, %v583_v34 }
 0x125   :  { %v582_v39 = vor.u32 %v581_v37, %v580_v35  ;;  %v585_v40 = vshll.u32 %v584_v38, 23 }
 0x127   :  { %v586_v41 = vor.u32 4788187, %v585_v40  ;;  %v589_v43 = vcvt.s32.f32 %v582_v39 }
 0x129   :  { %v587_v42 = vand.u32 2147483647, %v586_v41 }
 0x12b   :  { %v590_v44 = vmul.f32 %v589_v43, %v587_v42 }
 0x12d   :  { %v591_v45 = vxor.u32 2147483648, %v590_v44 }
 0x12f   :  { %v592_v46 = vsel %vm509_vm10, %v591_v45, %v590_v44 }
 0x130   :  { %v595_v47 = vsel %vm508_vm11, %v797_v30, %v592_v46 }
 0x131   :  { %689 = vcosq.f32 %v595_v47 }
 0x132   :  { %691 = vsinq.f32 %v595_v47 }
 0x13e   :  { %v690_v54 = vpop.eup %689 }
 0x13f   :  { %v692_v56 = vpop.eup %691  ;;  %v606_v57 = vxor.u32 2147483648, %v690_v54 }
 0x140   :  { %v603_v58 = vxor.u32 2147483648, %v692_v56 }
 0x141   :  { %v607_v59 = vsel %vm605_vm12, %v606_v57, %v692_v56 }
 0x142   :  { %v604_v36 = vsel %vm602_vm13, %v690_v54, %v603_v58 }
 0x143   :  { %v608_v60 = vsel %vm601_vm15, %v604_v36, %v607_v59 }
 0x144   :  { %v609_v61 = vsel %vm599_vm0, nan, %v608_v60 }
 0x145   :  { %v610_v62 = vsel %vm506_vm14, %v609_v61, %v797_v30 }
 0x146   :  { %611 = vst [vmem:[#allocation7] sm:$0xff] %v610_v62 }
 0x147   :  { %744 = shalt.err (!%p741_p0)
}
 0x148   :  { %621 = dma.vmem_to_hbm [thread:$0]  %s619_s1, 128, %s824_s2, [#allocation4]  }
 0x149   :  { %757 = dma.done.wait [#allocation4], 128  }
 0x14a   :  { %758 = vsyncadd [#allocation4], 4294967168 }
 0x14b   :  { %625 = vsyncpa [#allocation3], 1 }
 0x14c   :  { %626 = vsyncpa [#allocation6], 1 }
 0x14d   :  { %627 = vsyncpa [#allocation4], 1 }

</bundles_post_ra>
